<compile_context>
chip_gen: v6e
topology: v6e:2x2x1
jax: 0.10.0
libtpu: 0.0.40
codegen_flags: <defaults>
</compile_context>

<pallas_src>
import functools

import jax
import jax.numpy as jnp
from jax.experimental import pallas as pl
from jax.experimental.pallas import tpu as pltpu


def _round_up(n: int, m: int) -> int:
    return ((n + m - 1) // m) * m


def _twin_critics_kernel(x_ref, w1_ref, b1_ref, w2_ref, b2_ref, w3_ref, b3_ref,
                         q_ref):
    """One batch tile of both TD3 critics (3-layer MLP each), fused."""
    H = w2_ref.shape[1]                   # hidden dim (256)
    x = x_ref[...]                        # (TB, in_dim) float32
    w1 = w1_ref[...]                      # (in_dim, 2H), compute dtype (bf16)
    cd = w1.dtype

    # --- fused layer 1 (both critics in one MXU pass) -----------------------
    h1 = jnp.dot(x.astype(cd), w1, preferred_element_type=jnp.float32)
    h1 = jnp.maximum(h1 + b1_ref[...], 0.0)          # f32 bias + ReLU (VPU)

    # --- layer 2 (one matmul per critic) ------------------------------------
    h2a = jnp.dot(h1[:, :H].astype(cd), w2_ref[0],
                  preferred_element_type=jnp.float32)
    h2a = jnp.maximum(h2a + b2_ref[:, :H], 0.0)
    h2b = jnp.dot(h1[:, H:].astype(cd), w2_ref[1],
                  preferred_element_type=jnp.float32)
    h2b = jnp.maximum(h2b + b2_ref[:, H:], 0.0)

    # --- fused heads: block-diagonal [2H, 2] weight -> lane-packed output ---
    h2 = jnp.concatenate([h2a.astype(cd), h2b.astype(cd)], axis=-1)  # (TB, 2H)
    q = jnp.dot(h2, w3_ref[...], preferred_element_type=jnp.float32)
    q_ref[...] = (q + b3_ref[...]).astype(q_ref.dtype)               # (TB, 2)


@functools.partial(jax.jit, static_argnames=("block_b", "weight_dtype"))
def twin_critics_forward(x, params_a, params_b, *, block_b: int = 512,
                         weight_dtype=jnp.bfloat16):
    """TwinCritics.forward: returns (q_a, q_b), each (B, 1) float32.

    params_{a,b} = (w1, b1, w2, b2, w3, b3); weights are [in, out], biases
    are (1, out).
    """
    B, in_dim = x.shape
    wa1, ba1, wa2, ba2, wa3, ba3 = params_a
    wb1, bb1, wb2, bb2, wb3, bb3 = params_b
    H = wa1.shape[1]
    f32 = jnp.float32
    wd = weight_dtype

    # Pack / fuse parameters (done under jit once per compile): fewer, larger
    # DMAs; bf16 weights halve the resident-weight bytes.
    w1 = jnp.concatenate([wa1, wb1], axis=1).astype(wd)            # (in, 2H)
    b1 = jnp.concatenate([ba1, bb1], axis=1).astype(f32)           # (1, 2H)
    w2 = jnp.stack([wa2, wb2], axis=0).astype(wd)                  # (2, H, H)
    b2 = jnp.concatenate([ba2, bb2], axis=1).astype(f32)           # (1, 2H)
    w3 = jnp.zeros((2 * H, 2), f32)
    w3 = w3.at[:H, 0:1].set(wa3).at[H:, 1:2].set(wb3).astype(wd)   # (2H, 2)
    b3 = jnp.concatenate([ba3, bb3], axis=1).astype(f32)           # (1, 2)

    # Batch tiling: tile is a multiple of 8 sublanes; pad batch to a multiple
    # of the tile so MXU passes and output stores are unmasked.
    tb = min(block_b, _round_up(B, 8))
    bp = _round_up(B, tb)
    if bp != B:
        x = jnp.pad(x, ((0, bp - B), (0, 0)))

    const2 = lambda i: (0, 0)
    q = pl.pallas_call(
        _twin_critics_kernel,
        out_shape=jax.ShapeDtypeStruct((bp, 2), f32),
        grid_spec=pltpu.PrefetchScalarGridSpec(
            num_scalar_prefetch=0,
            grid=(bp // tb,),
            in_specs=[
                pl.BlockSpec((tb, in_dim), lambda i: (i, 0)),   # x: batch-tiled
                pl.BlockSpec(w1.shape, const2),                 # weights stay
                pl.BlockSpec(b1.shape, const2),                 #   VMEM-resident
                pl.BlockSpec(w2.shape, lambda i: (0, 0, 0)),
                pl.BlockSpec(b2.shape, const2),
                pl.BlockSpec(w3.shape, const2),
                pl.BlockSpec(b3.shape, const2),
            ],
            out_specs=pl.BlockSpec((tb, 2), lambda i: (i, 0)),
        ),
        compiler_params=pltpu.CompilerParams(
            dimension_semantics=("parallel",),   # megacore sharding on v7x
        ),
    )(x, w1, b1, w2, b2, w3, b3)

    return q[:B, 0:1], q[:B, 1:2]


def _init_critic_params(key, in_dim, hid_dim, out_dim):
    """Deterministic synthetic init (uniform, PyTorch-like fan-in scaling)."""
    keys = jax.random.split(key, 6)

    def lin(kw, kb, fan_in, fan_out):
        bound = 1.0 / jnp.sqrt(jnp.float32(fan_in))
        w = jax.random.uniform(kw, (fan_in, fan_out), jnp.float32, -bound, bound)
        b = jax.random.uniform(kb, (1, fan_out), jnp.float32, -bound, bound)
        return w, b

    w1, b1 = lin(keys[0], keys[1], in_dim, hid_dim)
    w2, b2 = lin(keys[2], keys[3], hid_dim, hid_dim)
    w3, b3 = lin(keys[4], keys[5], hid_dim, out_dim)
    return (w1, b1, w2, b2, w3, b3)


def _reference_forward(x, params, compute_dtype=jnp.bfloat16):
    """Pure-JAX reference matching the kernel's mixed precision."""
    w1, b1, w2, b2, w3, b3 = params

    def dot(a, w):
        return jnp.dot(a.astype(compute_dtype), w.astype(compute_dtype),
                       preferred_element_type=jnp.float32)

    h = jnp.maximum(dot(x, w1) + b1, 0.0)
    h = jnp.maximum(dot(h, w2) + b2, 0.0)
    return dot(h, w3) + b3


if __name__ == "__main__":
    # Critic(inp_dim=8, out_dim=4) -> MLP input dim 12, hidden 256, output 1.
    inp_dim, out_dim, hid_dim = 8, 4, 256
    in_dim = inp_dim + out_dim

    key = jax.random.PRNGKey(0)
    kx, ka, kb, kx2 = jax.random.split(key, 4)

    params_a = _init_critic_params(ka, in_dim, hid_dim, 1)
    params_b = _init_critic_params(kb, in_dim, hid_dim, 1)

    # --- small demo batch (single grid step) --------------------------------
    batch = 2
    x = jax.random.normal(kx, (batch, in_dim), jnp.float32)
    qa, qb = twin_critics_forward(x, params_a, params_b)
    qa, qb = jax.block_until_ready((qa, qb))

    ref_a = _reference_forward(x, params_a)
    ref_b = _reference_forward(x, params_b)
    assert qa.shape == (batch, 1) and qb.shape == (batch, 1)
    assert jnp.allclose(qa, ref_a, atol=1e-3, rtol=1e-3)
    assert jnp.allclose(qb, ref_b, atol=1e-3, rtol=1e-3)

    # --- multi-tile batch with padding (exercises the grid) -----------------
    batch2 = 50
    x2 = jax.random.normal(kx2, (batch2, in_dim), jnp.float32)
    qa2, qb2 = twin_critics_forward(x2, params_a, params_b, block_b=16)
    qa2, qb2 = jax.block_until_ready((qa2, qb2))
    assert qa2.shape == (batch2, 1) and qb2.shape == (batch2, 1)
    assert jnp.allclose(qa2, _reference_forward(x2, params_a), atol=1e-3, rtol=1e-3)
    assert jnp.allclose(qb2, _reference_forward(x2, params_b), atol=1e-3, rtol=1e-3)

    print("KERNEL_OK")
</pallas_src>

<mosaic_0001>
module attributes {stable_mosaic.version = 11 : i64} {
  func.func @_twin_critics_kernel(%arg0: i32, %arg1: memref<8x12xf32, #tpu.memory_space<vmem>>, %arg2: memref<12x512xbf16, #tpu.memory_space<vmem>>, %arg3: memref<1x512xf32, #tpu.memory_space<vmem>>, %arg4: memref<2x256x256xbf16, #tpu.memory_space<vmem>>, %arg5: memref<1x512xf32, #tpu.memory_space<vmem>>, %arg6: memref<512x2xbf16, #tpu.memory_space<vmem>>, %arg7: memref<1x2xf32, #tpu.memory_space<vmem>>, %arg8: memref<8x2xf32, #tpu.memory_space<vmem>>) attributes {dimension_semantics = [#tpu.dimension_semantics<parallel>], iteration_bounds = array<i64: 1>, scalar_prefetch = 0 : i64, scratch_operands = 0 : i64, tpu.core_type = #tpu.core_type<tc>, window_params = [{transform_indices = @transform_0, window_bounds = array<i64: 8, 12>}, {pipeline_mode = #tpu.pipeline_mode<synchronous>, transform_indices = @transform_1, window_bounds = array<i64: 12, 512>}, {pipeline_mode = #tpu.pipeline_mode<synchronous>, transform_indices = @transform_2, window_bounds = array<i64: 1, 512>}, {pipeline_mode = #tpu.pipeline_mode<synchronous>, transform_indices = @transform_3, window_bounds = array<i64: 2, 256, 256>}, {pipeline_mode = #tpu.pipeline_mode<synchronous>, transform_indices = @transform_4, window_bounds = array<i64: 1, 512>}, {pipeline_mode = #tpu.pipeline_mode<synchronous>, transform_indices = @transform_5, window_bounds = array<i64: 512, 2>}, {pipeline_mode = #tpu.pipeline_mode<synchronous>, transform_indices = @transform_6, window_bounds = array<i64: 1, 2>}, {transform_indices = @transform_7, window_bounds = array<i64: 8, 2>}]} {
    %c0 = arith.constant 0 : index
    %c0_0 = arith.constant 0 : index
    %0 = vector.load %arg1[%c0, %c0_0] : memref<8x12xf32, #tpu.memory_space<vmem>>, vector<8x12xf32>
    %c0_1 = arith.constant 0 : index
    %c0_2 = arith.constant 0 : index
    %1 = vector.load %arg2[%c0_1, %c0_2] : memref<12x512xbf16, #tpu.memory_space<vmem>>, vector<12x512xbf16>
    %2 = arith.truncf %0 : vector<8x12xf32> to vector<8x12xbf16>
    %cst = arith.constant dense<0.000000e+00> : vector<8x512xf32>
    %3 = tpu.matmul %2, %1, %cst {dimension_numbers = #tpu.dot_dimension_numbers<[1], [0], [0], [1], [0, 0, 1, 1], [], []>} : vector<8x12xbf16>, vector<12x512xbf16>, vector<8x512xf32> -> vector<8x512xf32>
    %c0_3 = arith.constant 0 : index
    %c0_4 = arith.constant 0 : index
    %4 = vector.load %arg3[%c0_3, %c0_4] : memref<1x512xf32, #tpu.memory_space<vmem>>, vector<1x512xf32>
    %5 = vector.broadcast %4 : vector<1x512xf32> to vector<8x512xf32>
    %6 = arith.addf %3, %5 : vector<8x512xf32>
    %cst_5 = arith.constant 0.000000e+00 : f32
    %7 = vector.broadcast %cst_5 : f32 to vector<8x512xf32>
    %8 = arith.maximumf %6, %7 : vector<8x512xf32>
    %9 = vector.extract_strided_slice %8 {offsets = [0, 0], sizes = [8, 256], strides = [1, 1]} : vector<8x512xf32> to vector<8x256xf32>
    %10 = arith.truncf %9 : vector<8x256xf32> to vector<8x256xbf16>
    %c0_6 = arith.constant 0 : index
    %c0_7 = arith.constant 0 : index
    %c0_8 = arith.constant 0 : index
    %11 = vector.load %arg4[%c0_6, %c0_7, %c0_8] : memref<2x256x256xbf16, #tpu.memory_space<vmem>>, vector<1x256x256xbf16>
    %12 = vector.shape_cast %11 : vector<1x256x256xbf16> to vector<256x256xbf16>
    %cst_9 = arith.constant dense<0.000000e+00> : vector<8x256xf32>
    %13 = tpu.matmul %10, %12, %cst_9 {dimension_numbers = #tpu.dot_dimension_numbers<[1], [0], [0], [1], [0, 0, 1, 1], [], []>} : vector<8x256xbf16>, vector<256x256xbf16>, vector<8x256xf32> -> vector<8x256xf32>
    %c0_10 = arith.constant 0 : index
    %c0_11 = arith.constant 0 : index
    %14 = vector.load %arg5[%c0_10, %c0_11] : memref<1x512xf32, #tpu.memory_space<vmem>>, vector<1x256xf32>
    %15 = vector.broadcast %14 : vector<1x256xf32> to vector<8x256xf32>
    %16 = arith.addf %13, %15 : vector<8x256xf32>
    %cst_12 = arith.constant 0.000000e+00 : f32
    %17 = vector.broadcast %cst_12 : f32 to vector<8x256xf32>
    %18 = arith.maximumf %16, %17 : vector<8x256xf32>
    %19 = vector.extract_strided_slice %8 {offsets = [0, 256], sizes = [8, 256], strides = [1, 1]} : vector<8x512xf32> to vector<8x256xf32>
    %20 = arith.truncf %19 : vector<8x256xf32> to vector<8x256xbf16>
    %c1 = arith.constant 1 : index
    %c0_13 = arith.constant 0 : index
    %c0_14 = arith.constant 0 : index
    %21 = vector.load %arg4[%c1, %c0_13, %c0_14] : memref<2x256x256xbf16, #tpu.memory_space<vmem>>, vector<1x256x256xbf16>
    %22 = vector.shape_cast %21 : vector<1x256x256xbf16> to vector<256x256xbf16>
    %cst_15 = arith.constant dense<0.000000e+00> : vector<8x256xf32>
    %23 = tpu.matmul %20, %22, %cst_15 {dimension_numbers = #tpu.dot_dimension_numbers<[1], [0], [0], [1], [0, 0, 1, 1], [], []>} : vector<8x256xbf16>, vector<256x256xbf16>, vector<8x256xf32> -> vector<8x256xf32>
    %c0_16 = arith.constant 0 : index
    %c256 = arith.constant 256 : index
    %24 = vector.load %arg5[%c0_16, %c256] : memref<1x512xf32, #tpu.memory_space<vmem>>, vector<1x256xf32>
    %25 = vector.broadcast %24 : vector<1x256xf32> to vector<8x256xf32>
    %26 = arith.addf %23, %25 : vector<8x256xf32>
    %cst_17 = arith.constant 0.000000e+00 : f32
    %27 = vector.broadcast %cst_17 : f32 to vector<8x256xf32>
    %28 = arith.maximumf %26, %27 : vector<8x256xf32>
    %29 = arith.truncf %18 : vector<8x256xf32> to vector<8x256xbf16>
    %30 = arith.truncf %28 : vector<8x256xf32> to vector<8x256xbf16>
    %31 = tpu.concatenate %29, %30 in 1 : vector<8x256xbf16>, vector<8x256xbf16> -> vector<8x512xbf16>
    %c0_18 = arith.constant 0 : index
    %c0_19 = arith.constant 0 : index
    %32 = vector.load %arg6[%c0_18, %c0_19] : memref<512x2xbf16, #tpu.memory_space<vmem>>, vector<512x2xbf16>
    %cst_20 = arith.constant dense<0.000000e+00> : vector<8x2xf32>
    %33 = tpu.matmul %31, %32, %cst_20 {dimension_numbers = #tpu.dot_dimension_numbers<[1], [0], [0], [1], [0, 0, 1, 1], [], []>} : vector<8x512xbf16>, vector<512x2xbf16>, vector<8x2xf32> -> vector<8x2xf32>
    %c0_21 = arith.constant 0 : index
    %c0_22 = arith.constant 0 : index
    %34 = vector.load %arg7[%c0_21, %c0_22] : memref<1x2xf32, #tpu.memory_space<vmem>>, vector<1x2xf32>
    %35 = vector.broadcast %34 : vector<1x2xf32> to vector<8x2xf32>
    %36 = arith.addf %33, %35 : vector<8x2xf32>
    %c0_23 = arith.constant 0 : index
    %c0_24 = arith.constant 0 : index
    %37 = vector.load %arg8[%c0_23, %c0_24] : memref<8x2xf32, #tpu.memory_space<vmem>>, vector<8x2xf32>
    tpu.vector_store %arg8[%c0_23, %c0_24], %36 {strides = array<i32>} : memref<8x2xf32, #tpu.memory_space<vmem>>, vector<8x2xf32>,
    return
  }
  func.func @transform_0(%arg0: i32) -> (i32, i32) {
    %c0_i32 = arith.constant 0 : i32
    %c0_i32_0 = arith.constant 0 : i32
    return %arg0, %c0_i32 : i32, i32
  }
  func.func @transform_1(%arg0: i32) -> (i32, i32) {
    %c0_i32 = arith.constant 0 : i32
    %c0_i32_0 = arith.constant 0 : i32
    %c0_i32_1 = arith.constant 0 : i32
    return %c0_i32, %c0_i32_0 : i32, i32
  }
  func.func @transform_2(%arg0: i32) -> (i32, i32) {
    %c0_i32 = arith.constant 0 : i32
    %c0_i32_0 = arith.constant 0 : i32
    %c0_i32_1 = arith.constant 0 : i32
    return %c0_i32, %c0_i32_0 : i32, i32
  }
  func.func @transform_3(%arg0: i32) -> (i32, i32, i32) {
    %c0_i32 = arith.constant 0 : i32
    %c0_i32_0 = arith.constant 0 : i32
    %c0_i32_1 = arith.constant 0 : i32
    %c0_i32_2 = arith.constant 0 : i32
    return %c0_i32, %c0_i32_0, %c0_i32_1 : i32, i32, i32
  }
  func.func @transform_4(%arg0: i32) -> (i32, i32) {
    %c0_i32 = arith.constant 0 : i32
    %c0_i32_0 = arith.constant 0 : i32
    %c0_i32_1 = arith.constant 0 : i32
    return %c0_i32, %c0_i32_0 : i32, i32
  }
  func.func @transform_5(%arg0: i32) -> (i32, i32) {
    %c0_i32 = arith.constant 0 : i32
    %c0_i32_0 = arith.constant 0 : i32
    %c0_i32_1 = arith.constant 0 : i32
    return %c0_i32, %c0_i32_0 : i32, i32
  }
  func.func @transform_6(%arg0: i32) -> (i32, i32) {
    %c0_i32 = arith.constant 0 : i32
    %c0_i32_0 = arith.constant 0 : i32
    %c0_i32_1 = arith.constant 0 : i32
    return %c0_i32, %c0_i32_0 : i32, i32
  }
  func.func @transform_7(%arg0: i32) -> (i32, i32) {
    %c0_i32 = arith.constant 0 : i32
    %c0_i32_0 = arith.constant 0 : i32
    return %arg0, %c0_i32 : i32, i32
  }
}

</mosaic_0001>

<bundles_post_ra>
// kernel: twin_critics_forward.1
= control target key start
LH: loop header
LB: loop body
LE: loop exit
PB: predicated region body
PF: predicated region fallthrough
CT: control target
= control target key end

     0   :  { %vm75_vm0 = vcmask 1045504   ;;  %v1342_v1 = vmov 0   ;;  %vm71_vm1 = vcmask 97280   ;;  %vm1020_vm2 = vcmask 15360   ;;  %s1711_s1 = inlined_call_operand.vmem [shape: bf16[12,512], index: 1, kind: input, shape index: {}]   ;;  %s1712_s0 = inlined_call_operand.vmem [shape: f32[8,12], index: 0, kind: input, shape index: {}]   ;;  %s1713_s3 = inlined_call_operand.vmem [shape: bf16[2,256,256], index: 3, kind: input, shape index: {}]   ;;  %s1714_s5 = inlined_call_operand.vmem [shape: bf16[512,2], index: 5, kind: input, shape index: {}]   ;;  %s1715_s2 = inlined_call_operand.vmem [shape: f32[1,512], index: 2, kind: input, shape index: {}]   ;;  %s1716_s4 = inlined_call_operand.vmem [shape: f32[1,512], index: 4, kind: input, shape index: {}]   ;;  %s1717_s6 = inlined_call_operand.vmem [shape: f32[1,2], index: 6, kind: input, shape index: {}]   ;;  %s1718_s7 = inlined_call_operand.vmem [shape: f32[8,2], index: 7, kind: output, shape index: {}]  }
   0x1   :  { %v1208_v0 = vld [vmem:[%s1711_s1 + $0x4] ss:$16 sps:$4 sm:$0x3f]   ;;  %120 = vmatprep.mubr.bf16.mxu0 %v1342_v1  ;;  %161 = vmatprep.mubr.bf16.mxu1 %v1342_v1  ;;  %v1210_v2 = vld [vmem:[%s1711_s1 + $0xc] ss:$16 sps:$4 sm:$0x3f]  }
   0x2   :  { %1030 = vmatprep.subr.msk.bf16.mxu0 %vm75_vm0, %v1208_v0  ;;  %v1212_v3 = vld [vmem:[%s1711_s1] ss:$16 sps:$4 sm:$0x3f]   ;;  %v1213_v4 = vld [vmem:[%s1711_s1 + $0x8] ss:$16 sps:$4 sm:$0x3f]   ;;  %1032 = vmatprep.subr.msk.bf16.mxu1 %vm75_vm0, %v1210_v2 }
   0x3   :  { %v27_v5 = vld [vmem:[%s1712_s0] sm:$0xff]  ;;  %v77_v6 = vsel %vm75_vm0, %v1212_v3, 0  ;;  %v83_v7 = vsel %vm75_vm0, %v1213_v4, 0  ;;  %v1214_v9 = vld [vmem:[%s1713_s3 + $0x70] ss:$8 sps:$4 sm:$0xff]  }
   0x4   :  { %v32_v8 = vpack.c.bf16 %v27_v5, %v27_v5  ;;  %v1216_v10 = vld [vmem:[%s1713_s3 + $0x74] ss:$8 sps:$4 sm:$0xff]   ;;  %103 = vmatpush1.bf16.msra.mxu0 %v77_v6  ;;  %144 = vmatpush1.bf16.msra.mxu1 %v83_v7  ;;  %v1217_v11 = vld [vmem:[%s1713_s3 + $0x170] ss:$8 sps:$4 sm:$0xff]   ;;  %v1222_v13 = vld [vmem:[%s1713_s3 + $0x64] ss:$8 sps:$4 sm:$0xff]  }
   0x5   :  { %380 = vmatprep.subr.bf16.mxu0 %v1216_v10  ;;  %v1219_v12 = vld [vmem:[%s1713_s3 + $0x174] ss:$8 sps:$4 sm:$0xff]   ;;  %v1220_v14 = vld [vmem:[%s1713_s3 + $0x60] ss:$8 sps:$4 sm:$0xff]   ;;  %v1225_v15 = vld [vmem:[%s1713_s3 + $0x164] ss:$8 sps:$4 sm:$0xff]  }
   0x6   :  { %630 = vmatprep.subr.bf16.mxu1 %v1219_v12  ;;  %v1223_v16 = vld [vmem:[%s1713_s3 + $0x160] ss:$8 sps:$4 sm:$0xff]   ;;  %v1228_v17 = vld [vmem:[%s1713_s3 + $0x54] ss:$8 sps:$4 sm:$0xff]   ;;  %v1226_v19 = vld [vmem:[%s1713_s3 + $0x50] ss:$8 sps:$4 sm:$0xff]  }
   0x7   :  { %1031 = vmatmul.mubr.msk.bf16.vlgmr.msra.gmra.mxu0 %vm71_vm1, %v32_v8  ;;  %1033 = vmatmul.mubr.msk.bf16.vlgmr.msra.gmra.mxu1 %vm71_vm1, %v32_v8  ;;  %v1231_v18 = vld [vmem:[%s1713_s3 + $0x154] ss:$8 sps:$4 sm:$0xff]   ;;  %v1229_v20 = vld [vmem:[%s1713_s3 + $0x150] ss:$8 sps:$4 sm:$0xff]   ;;  %v1234_v21 = vld [vmem:[%s1713_s3 + $0x44] ss:$8 sps:$4 sm:$0xff]  }
   0x8   :  { %381 = vmatpush1.bf16.msra.mxu0 %v1214_v9  ;;  %631 = vmatpush1.bf16.msra.mxu1 %v1217_v11  ;;  %v1237_v22 = vld [vmem:[%s1713_s3 + $0x144] ss:$8 sps:$4 sm:$0xff]   ;;  %v1232_v23 = vld [vmem:[%s1713_s3 + $0x40] ss:$8 sps:$4 sm:$0xff]   ;;  %v1240_v25 = vld [vmem:[%s1713_s3 + $0x34] ss:$8 sps:$4 sm:$0xff]   ;;  %v35_v11 = vlaneseq }
   0x9   :  { %382 = vmatprep.subr.bf16.mxu0 %v1222_v13  ;;  %632 = vmatprep.subr.bf16.mxu1 %v1225_v15  ;;  %v1235_v24 = vld [vmem:[%s1713_s3 + $0x140] ss:$8 sps:$4 sm:$0xff]   ;;  %v1243_v26 = vld [vmem:[%s1713_s3 + $0x134] ss:$8 sps:$4 sm:$0xff]   ;;  %v1238_v27 = vld [vmem:[%s1713_s3 + $0x30] ss:$8 sps:$4 sm:$0xff]  }
   0xa   :  { %v1241_v28 = vld [vmem:[%s1713_s3 + $0x130] ss:$8 sps:$4 sm:$0xff]   ;;  %v1246_v29 = vld [vmem:[%s1713_s3 + $0x24] ss:$8 sps:$4 sm:$0xff]   ;;  %v1244_v31 = vld [vmem:[%s1713_s3 + $0x20] ss:$8 sps:$4 sm:$0xff]  }
   0xb   :  { %v1249_v30 = vld [vmem:[%s1713_s3 + $0x124] ss:$8 sps:$4 sm:$0xff]   ;;  %v1247_v32 = vld [vmem:[%s1713_s3 + $0x120] ss:$8 sps:$4 sm:$0xff]   ;;  %v1252_v33 = vld [vmem:[%s1713_s3 + $0x14] ss:$8 sps:$4 sm:$0xff]  }
   0xc   :  { %383 = vmatpush1.bf16.msra.mxu0 %v1220_v14  ;;  %633 = vmatpush1.bf16.msra.mxu1 %v1223_v16  ;;  %v1255_v34 = vld [vmem:[%s1713_s3 + $0x114] ss:$8 sps:$4 sm:$0xff]   ;;  %v1250_v35 = vld [vmem:[%s1713_s3 + $0x10] ss:$8 sps:$4 sm:$0xff]   ;;  %v1258_v37 = vld [vmem:[%s1713_s3 + $0x4] ss:$8 sps:$4 sm:$0xff]  }
   0xd   :  { %384 = vmatprep.subr.bf16.mxu0 %v1228_v17  ;;  %634 = vmatprep.subr.bf16.mxu1 %v1231_v18  ;;  %v1253_v36 = vld [vmem:[%s1713_s3 + $0x110] ss:$8 sps:$4 sm:$0xff]   ;;  %v1261_v38 = vld [vmem:[%s1713_s3 + $0x104] ss:$8 sps:$4 sm:$0xff]   ;;  %v1256_v39 = vld [vmem:[%s1713_s3] ss:$8 sps:$4 sm:$0xff]  }
   0xe   :  { %v1259_v40 = vld [vmem:[%s1713_s3 + $0x100] ss:$8 sps:$4 sm:$0xff]   ;;  %v1264_v41 = vld [vmem:[%s1713_s3 + $0xf4] ss:$8 sps:$4 sm:$0xff]   ;;  %v1262_v43 = vld [vmem:[%s1713_s3 + $0xf0] ss:$8 sps:$4 sm:$0xff]  }
   0xf   :  { %v1267_v42 = vld [vmem:[%s1713_s3 + $0x1f4] ss:$8 sps:$4 sm:$0xff]   ;;  %v1265_v44 = vld [vmem:[%s1713_s3 + $0x1f0] ss:$8 sps:$4 sm:$0xff]   ;;  %v1270_v45 = vld [vmem:[%s1713_s3 + $0xe4] ss:$8 sps:$4 sm:$0xff]  }
  0x10   :  { %385 = vmatpush1.bf16.msra.mxu0 %v1226_v19  ;;  %635 = vmatpush1.bf16.msra.mxu1 %v1229_v20  ;;  %v1268_v46 = vld [vmem:[%s1713_s3 + $0xe0] ss:$8 sps:$4 sm:$0xff]   ;;  %v1273_v47 = vld [vmem:[%s1713_s3 + $0x1e4] ss:$8 sps:$4 sm:$0xff]   ;;  %v1276_v49 = vld [vmem:[%s1713_s3 + $0xd4] ss:$8 sps:$4 sm:$0xff]  }
  0x11   :  { %386 = vmatprep.subr.bf16.mxu0 %v1234_v21  ;;  %636 = vmatprep.subr.bf16.mxu1 %v1237_v22  ;;  %v1271_v48 = vld [vmem:[%s1713_s3 + $0x1e0] ss:$8 sps:$4 sm:$0xff]   ;;  %v1279_v50 = vld [vmem:[%s1713_s3 + $0x1d4] ss:$8 sps:$4 sm:$0xff]   ;;  %v1274_v51 = vld [vmem:[%s1713_s3 + $0xd0] ss:$8 sps:$4 sm:$0xff]  }
  0x12   :  { %v1277_v52 = vld [vmem:[%s1713_s3 + $0x1d0] ss:$8 sps:$4 sm:$0xff]   ;;  %v1282_v53 = vld [vmem:[%s1713_s3 + $0xc4] ss:$8 sps:$4 sm:$0xff]   ;;  %v1280_v55 = vld [vmem:[%s1713_s3 + $0xc0] ss:$8 sps:$4 sm:$0xff]  }
  0x13   :  { %v1285_v54 = vld [vmem:[%s1713_s3 + $0x1c4] ss:$8 sps:$4 sm:$0xff]   ;;  %v1283_v56 = vld [vmem:[%s1713_s3 + $0x1c0] ss:$8 sps:$4 sm:$0xff]   ;;  %v1288_v57 = vld [vmem:[%s1713_s3 + $0xb4] ss:$8 sps:$4 sm:$0xff]  }
  0x14   :  { %387 = vmatpush1.bf16.msra.mxu0 %v1232_v23  ;;  %637 = vmatpush1.bf16.msra.mxu1 %v1235_v24  ;;  %v1291_v58 = vld [vmem:[%s1713_s3 + $0x1b4] ss:$8 sps:$4 sm:$0xff]   ;;  %v1286_v59 = vld [vmem:[%s1713_s3 + $0xb0] ss:$8 sps:$4 sm:$0xff]   ;;  %v1294_v61 = vld [vmem:[%s1713_s3 + $0xa4] ss:$8 sps:$4 sm:$0xff]  }
  0x15   :  { %388 = vmatprep.subr.bf16.mxu0 %v1240_v25  ;;  %638 = vmatprep.subr.bf16.mxu1 %v1243_v26  ;;  %v1289_v60 = vld [vmem:[%s1713_s3 + $0x1b0] ss:$8 sps:$4 sm:$0xff]   ;;  %v1297_v62 = vld [vmem:[%s1713_s3 + $0x1a4] ss:$8 sps:$4 sm:$0xff]   ;;  %v1292_v63 = vld [vmem:[%s1713_s3 + $0xa0] ss:$8 sps:$4 sm:$0xff]  }
  0x16   :  { %v1295_v0 = vld [vmem:[%s1713_s3 + $0x1a0] ss:$8 sps:$4 sm:$0xff]   ;;  %v1300_v1 = vld [vmem:[%s1713_s3 + $0x94] ss:$8 sps:$4 sm:$0xff]   ;;  %v1298_v3 = vld [vmem:[%s1713_s3 + $0x90] ss:$8 sps:$4 sm:$0xff]  }
  0x17   :  { %v1303_v2 = vld [vmem:[%s1713_s3 + $0x194] ss:$8 sps:$4 sm:$0xff]   ;;  %v1301_v4 = vld [vmem:[%s1713_s3 + $0x190] ss:$8 sps:$4 sm:$0xff]   ;;  %v1306_v5 = vld [vmem:[%s1713_s3 + $0x84] ss:$8 sps:$4 sm:$0xff]  }
  0x18   :  { %389 = vmatpush1.bf16.msra.mxu0 %v1238_v27  ;;  %639 = vmatpush1.bf16.msra.mxu1 %v1241_v28  ;;  %v1309_v6 = vld [vmem:[%s1713_s3 + $0x184] ss:$8 sps:$4 sm:$0xff]   ;;  %v1304_v7 = vld [vmem:[%s1713_s3 + $0x80] ss:$8 sps:$4 sm:$0xff]   ;;  %v1310_v9 = vld [vmem:[%s1714_s5 + $0x78] sm:$0xff]   ;;  %v36_v12 = vshrl.u32 %v35_v11, 7 }
  0x19   :  { %390 = vmatprep.subr.bf16.mxu0 %v1246_v29  ;;  %640 = vmatprep.subr.bf16.mxu1 %v1249_v30  ;;  %v1307_v8 = vld [vmem:[%s1713_s3 + $0x180] ss:$8 sps:$4 sm:$0xff]   ;;  %v1311_v10 = vld [vmem:[%s1714_s5 + $0xf8] sm:$0xff]  }
  0x1a   :  { %v1596_v13 = vsub.s32 0, %v36_v12  ;;  %v45_v14 = vsub.s32 2, %v36_v12  ;;  %v33_v15 = vld [vmem:[%s1715_s2] sm:$0xf]  ;;  %v1601_v16 = vsub.s32 1, %v36_v12  ;;  %v49_v17 = vsub.s32 3, %v36_v12 }
  0x1c   :  { %391 = vmatpush1.bf16.msra.mxu0 %v1244_v31  ;;  %641 = vmatpush1.bf16.msra.mxu1 %v1247_v32  ;;  %v38_v18 = vrot.slane %v33_v15, %v1596_v13  ;;  %v46_v19 = vrot.slane %v33_v15, %v45_v14  ;;  %v42_v20 = vrot.slane %v33_v15, %v1601_v16 }
  0x1d   :  { %392 = vmatprep.subr.bf16.mxu0 %v1252_v33  ;;  %642 = vmatprep.subr.bf16.mxu1 %v1255_v34  ;;  %v50_v21 = vrot.slane %v33_v15, %v49_v17 }
  0x20   :  { %393 = vmatpush1.bf16.msra.mxu0 %v1250_v35  ;;  %643 = vmatpush1.bf16.msra.mxu1 %v1253_v36 }
  0x21   :  { %394 = vmatprep.subr.bf16.mxu0 %v1258_v37  ;;  %644 = vmatprep.subr.bf16.mxu1 %v1261_v38 }
  0x24   :  { %395 = vmatpush1.bf16.msra.mxu0 %v1256_v39  ;;  %645 = vmatpush1.bf16.msra.mxu1 %v1259_v40 }
  0x25   :  { %396 = vmatprep.subr.bf16.mxu0 %v1264_v41  ;;  %646 = vmatprep.subr.bf16.mxu1 %v1267_v42  ;;  %v1312_v41 = vld [vmem:[%s1714_s5 + $0x38] sm:$0xff]  }
  0x26   :  { %v1313_v42 = vld [vmem:[%s1714_s5 + $0xb8] sm:$0xff]  }
  0x28   :  { %397 = vmatpush2.bf16.msra.mxu0 %v1262_v43  ;;  %647 = vmatpush2.bf16.msra.mxu1 %v1265_v44  ;;  %v1314_v44 = vld [vmem:[%s1714_s5 + $0x70] sm:$0xff]  }
  0x29   :  { %398 = vmatprep.subr.bf16.mxu0 %v1270_v45  ;;  %648 = vmatprep.subr.bf16.mxu1 %v1273_v47  ;;  %v1315_v45 = vld [vmem:[%s1714_s5 + $0xf0] sm:$0xff]  }
  0x2a   :  { %v1317_v47 = vld [vmem:[%s1714_s5 + $0xb0] sm:$0xff]  }
  0x2c   :  { %399 = vmatpush2.bf16.msra.mxu0 %v1268_v46  ;;  %649 = vmatpush2.bf16.msra.mxu1 %v1271_v48  ;;  %v1316_v46 = vld [vmem:[%s1714_s5 + $0x30] sm:$0xff]   ;;  %v1318_v48 = vld [vmem:[%s1714_s5 + $0x68] sm:$0xff]  }
  0x2d   :  { %400 = vmatprep.subr.bf16.mxu0 %v1276_v49  ;;  %650 = vmatprep.subr.bf16.mxu1 %v1279_v50  ;;  %v1319_v49 = vld [vmem:[%s1714_s5 + $0xe8] sm:$0xff]  }
  0x2e   :  { %v1320_v50 = vld [vmem:[%s1714_s5 + $0x28] sm:$0xff]  }
  0x30   :  { %401 = vmatpush2.bf16.msra.mxu0 %v1274_v51  ;;  %651 = vmatpush2.bf16.msra.mxu1 %v1277_v52  ;;  %v1321_v51 = vld [vmem:[%s1714_s5 + $0xa8] sm:$0xff]   ;;  %v1322_v52 = vld [vmem:[%s1714_s5 + $0x60] sm:$0xff]  }
  0x31   :  { %402 = vmatprep.subr.bf16.mxu0 %v1282_v53  ;;  %652 = vmatprep.subr.bf16.mxu1 %v1285_v54  ;;  %v1323_v53 = vld [vmem:[%s1714_s5 + $0xe0] sm:$0xff]  }
  0x32   :  { %v1324_v54 = vld [vmem:[%s1714_s5 + $0x20] sm:$0xff]  }
  0x34   :  { %403 = vmatpush2.bf16.msra.mxu0 %v1280_v55  ;;  %653 = vmatpush2.bf16.msra.mxu1 %v1283_v56  ;;  %v1325_v55 = vld [vmem:[%s1714_s5 + $0xa0] sm:$0xff]   ;;  %v1326_v56 = vld [vmem:[%s1714_s5 + $0x58] sm:$0xff]  }
  0x35   :  { %404 = vmatprep.subr.bf16.mxu0 %v1288_v57  ;;  %654 = vmatprep.subr.bf16.mxu1 %v1291_v58  ;;  %v1327_v57 = vld [vmem:[%s1714_s5 + $0xd8] sm:$0xff]  }
  0x36   :  { %v1328_v58 = vld [vmem:[%s1714_s5 + $0x18] sm:$0xff]  }
  0x38   :  { %405 = vmatpush2.bf16.msra.mxu0 %v1286_v59  ;;  %655 = vmatpush2.bf16.msra.mxu1 %v1289_v60  ;;  %v1329_v59 = vld [vmem:[%s1714_s5 + $0x98] sm:$0xff]   ;;  %v1330_v60 = vld [vmem:[%s1714_s5 + $0x50] sm:$0xff]  }
  0x39   :  { %406 = vmatprep.subr.bf16.mxu0 %v1294_v61  ;;  %656 = vmatprep.subr.bf16.mxu1 %v1297_v62  ;;  %v1331_v61 = vld [vmem:[%s1714_s5 + $0xd0] sm:$0xff]  }
  0x3a   :  { %v1332_v62 = vld [vmem:[%s1714_s5 + $0x10] sm:$0xff]  }
  0x3c   :  { %407 = vmatpush2.bf16.msra.mxu0 %v1292_v63  ;;  %657 = vmatpush2.bf16.msra.mxu1 %v1295_v0  ;;  %v1333_v63 = vld [vmem:[%s1714_s5 + $0x90] sm:$0xff]   ;;  %v1334_v0 = vld [vmem:[%s1714_s5 + $0x48] sm:$0xff]  }
  0x3d   :  { %408 = vmatprep.subr.bf16.mxu0 %v1300_v1  ;;  %658 = vmatprep.subr.bf16.mxu1 %v1303_v2  ;;  %v1335_v1 = vld [vmem:[%s1714_s5 + $0xc8] sm:$0xff]  }
  0x3e   :  { %v1336_v2 = vld [vmem:[%s1714_s5 + $0x8] sm:$0xff]  }
  0x40   :  { %409 = vmatpush2.bf16.msra.mxu0 %v1298_v3  ;;  %659 = vmatpush2.bf16.msra.mxu1 %v1301_v4  ;;  %v1337_v3 = vld [vmem:[%s1714_s5 + $0x88] sm:$0xff]   ;;  %v1338_v4 = vld [vmem:[%s1714_s5 + $0x40] sm:$0xff]  }
  0x41   :  { %410 = vmatprep.subr.bf16.mxu0 %v1306_v5  ;;  %660 = vmatprep.subr.bf16.mxu1 %v1309_v6  ;;  %v1339_v5 = vld [vmem:[%s1714_s5 + $0xc0] sm:$0xff]  }
  0x42   :  { %v1340_v6 = vld [vmem:[%s1714_s5] sm:$0xff]  }
  0x44   :  { %411 = vmatpush2.bf16.msra.mxu0 %v1304_v7  ;;  %661 = vmatpush2.bf16.msra.mxu1 %v1307_v8  ;;  %v1341_v7 = vld [vmem:[%s1714_s5 + $0x80] sm:$0xff]  }
  0x45   :  { %1163 = vmatprep.subr.bf16.mxu0 %v1310_v9  ;;  %1185 = vmatprep.subr.bf16.mxu1 %v1311_v10  ;;  %v208_v8 = vld [vmem:[%s1716_s4] sm:$0x3]  ;;  %v458_v9 = vld [vmem:[%s1716_s4 + $0x2] sm:$0x3] }
  0x46   :  { %v213_v10 = vrot.slane %v208_v8, %v1596_v13  ;;  %v463_v11 = vrot.slane %v458_v9, %v1596_v13  ;;  %v217_v12 = vrot.slane %v208_v8, %v1601_v16  ;;  %v467_v14 = vrot.slane %v458_v9, %v1601_v16 }
  0xc7   :  { %v122_v22 = vpop.f32.mrf.mxu0  ;;  %v163_v23 = vpop.f32.mrf.mxu1 }
  0xc8   :  { %v123_v24 = vadd.f32 %v122_v22, %v38_v18  ;;  %v164_v25 = vadd.f32 %v163_v23, %v46_v19 }
  0xc9   :  { %v124_v26 = vpop.f32.mrf.mxu0  ;;  %v165_v27 = vpop.f32.mrf.mxu1 }
  0xca   :  { %v172_v28 = vmax.f32 %v164_v25, 0.0  ;;  %v125_v29 = vadd.f32 %v124_v26, %v42_v20  ;;  %v166_v30 = vadd.f32 %v165_v27, %v50_v21  ;;  %v170_v31 = vmax.f32 %v123_v24, 0.0 }
  0xcb   :  { %v126_v32 = vpop.f32.mrf.mxu0  ;;  %v167_v33 = vpop.f32.mrf.mxu1 }
  0xcc   :  { %v171_v34 = vmax.f32 %v125_v29, 0.0  ;;  %v173_v35 = vmax.f32 %v166_v30, 0.0  ;;  %v423_v36 = vpack.c.bf16 %v172_v28, %v172_v28  ;;  %v174_v43 = vpack.c.bf16 %v170_v31, %v170_v31 }
  0xcd   :  { %v127_v37 = vpop.f32.mrf.mxu0  ;;  %v168_v38 = vpop.f32.mrf.mxu1 }
  0xce   :  { %v175_v39 = vpack.c.bf16 %v171_v34, %v171_v34  ;;  %v424_v40 = vpack.c.bf16 %v173_v35, %v173_v35 }
  0xd0   :  { %412 = vmatprep.mubr.bf16.mxu0 %v175_v39  ;;  %662 = vmatprep.mubr.bf16.mxu1 %v424_v40 }
  0xd1   :  { %413 = vmatmul.mubr.bf16.vlgmr.msra.gmra.mxu0 %v174_v43  ;;  %663 = vmatmul.mubr.bf16.vlgmr.msra.gmra.mxu1 %v423_v36  ;;  %v1130_v36 = vld [vmem:[%s1717_s6] ss:$0 sm:$0xff] }
  0xd2   :  { %1164 = vmatpush3.bf16.msra.mxu0 %v1312_v41  ;;  %1186 = vmatpush3.bf16.msra.mxu1 %v1313_v42 }
  0xd3   :  { %1165 = vmatprep.subr.bf16.mxu0 %v1314_v44  ;;  %1187 = vmatprep.subr.bf16.mxu1 %v1315_v45 }
  0xd6   :  { %1166 = vmatpush3.bf16.msra.mxu0 %v1316_v46  ;;  %1188 = vmatpush3.bf16.msra.mxu1 %v1317_v47 }
  0xd7   :  { %1167 = vmatprep.subr.bf16.mxu0 %v1318_v48  ;;  %1189 = vmatprep.subr.bf16.mxu1 %v1319_v49 }
  0xda   :  { %1168 = vmatpush3.bf16.msra.mxu0 %v1320_v50  ;;  %1190 = vmatpush3.bf16.msra.mxu1 %v1321_v51 }
  0xdb   :  { %1169 = vmatprep.subr.bf16.mxu0 %v1322_v52  ;;  %1191 = vmatprep.subr.bf16.mxu1 %v1323_v53 }
  0xde   :  { %1170 = vmatpush3.bf16.msra.mxu0 %v1324_v54  ;;  %1192 = vmatpush3.bf16.msra.mxu1 %v1325_v55 }
  0xdf   :  { %1171 = vmatprep.subr.bf16.mxu0 %v1326_v56  ;;  %1193 = vmatprep.subr.bf16.mxu1 %v1327_v57 }
  0xe2   :  { %1172 = vmatpush3.bf16.msra.mxu0 %v1328_v58  ;;  %1194 = vmatpush3.bf16.msra.mxu1 %v1329_v59 }
  0xe3   :  { %1173 = vmatprep.subr.bf16.mxu0 %v1330_v60  ;;  %1195 = vmatprep.subr.bf16.mxu1 %v1331_v61 }
  0xe6   :  { %1174 = vmatpush3.bf16.msra.mxu0 %v1332_v62  ;;  %1196 = vmatpush3.bf16.msra.mxu1 %v1333_v63 }
  0xe7   :  { %1175 = vmatprep.subr.bf16.mxu0 %v1334_v0  ;;  %1197 = vmatprep.subr.bf16.mxu1 %v1335_v1 }
  0xea   :  { %1176 = vmatpush3.bf16.msra.mxu0 %v1336_v2  ;;  %1198 = vmatpush3.bf16.msra.mxu1 %v1337_v3 }
  0xeb   :  { %1177 = vmatprep.subr.bf16.mxu0 %v1338_v4  ;;  %1199 = vmatprep.subr.bf16.mxu1 %v1339_v5 }
  0xee   :  { %1178 = vmatpush3.bf16.msra.mxu0 %v1340_v6  ;;  %1200 = vmatpush3.bf16.msra.mxu1 %v1341_v7 }
 0x191   :  { %v414_v15 = vpop.f32.mrf.mxu0  ;;  %v664_v17 = vpop.f32.mrf.mxu1 }
 0x192   :  { %v415_v18 = vadd.f32 %v414_v15, %v213_v10  ;;  %v665_v19 = vadd.f32 %v664_v17, %v463_v11 }
 0x193   :  { %v416_v20 = vpop.f32.mrf.mxu0  ;;  %v666_v21 = vpop.f32.mrf.mxu1 }
 0x194   :  { %v417_v22 = vadd.f32 %v416_v20, %v217_v12  ;;  %v667_v23 = vadd.f32 %v666_v21, %v467_v14  ;;  %v421_v24 = vmax.f32 %v415_v18, 0.0  ;;  %v671_v25 = vmax.f32 %v665_v19, 0.0 }
 0x195   :  { %v418_v26 = vpop.f32.mrf.mxu0  ;;  %v668_v27 = vpop.f32.mrf.mxu1 }
 0x196   :  { %v422_v28 = vmax.f32 %v417_v22, 0.0  ;;  %v672_v29 = vmax.f32 %v667_v23, 0.0  ;;  %v673_v33 = vpack.c.bf16 %v421_v24, %v421_v24  ;;  %v675_v16 = vpack.c.bf16 %v671_v25, %v671_v25 }
 0x197   :  { %v419_v30 = vpop.f32.mrf.mxu0  ;;  %v669_v13 = vpop.f32.mrf.mxu1 }
 0x198   :  { %v674_v31 = vpack.c.bf16 %v422_v28, %v422_v28  ;;  %v676_v32 = vpack.c.bf16 %v672_v29, %v672_v29 }
 0x19a   :  { %972 = vmatprep.mubr.bf16.mxu0 %v674_v31  ;;  %1012 = vmatprep.mubr.bf16.mxu1 %v676_v32 }
 0x19b   :  { %973 = vmatmul.mubr.bf16.vlgmr.msra.gmra.mxu0 %v673_v33  ;;  %1013 = vmatmul.mubr.bf16.vlgmr.msra.gmra.mxu1 %v675_v16 }
 0x25b   :  { %v1179_v34 = vpop.f32.mrf.mxu0  ;;  %v1201_v35 = vpop.f32.mrf.mxu1 }
 0x25d   :  { %v1180_v37 = vpop.f32.mrf.mxu0  ;;  %v1202_v38 = vpop.f32.mrf.mxu1 }
 0x25e   :  { %v1181_v39 = vadd.f32 %v1180_v37, %v1179_v34  ;;  %v1203_v43 = vadd.f32 %v1202_v38, %v1201_v35 }
 0x25f   :  { %v1182_v40 = vpop.f32.mrf.mxu0  ;;  %v1204_v41 = vpop.f32.mrf.mxu1 }
 0x260   :  { %v975_v42 = vadd.f32 %v1181_v39, %v1130_v36 }
 0x261   :  { %v1183_v44 = vpop.f32.mrf.mxu0  ;;  %v1205_v45 = vpop.f32.mrf.mxu1 }
 0x262   :  { %v1015_v46 = vadd.f32 %v1203_v43, %v975_v42 }
 0x264   :  { %1021 = vst.msk [vmem:[%s1718_s7] sm:$0xff] %vm1020_vm2, %v1015_v46 }

</bundles_post_ra>
